<compile_context>
chip_gen: v7x
topology: tpu7x:2x2x1
jax: 0.10.0
libtpu: 0.0.40
codegen_flags: <defaults>
</compile_context>

<pallas_src>
import functools
import math

import jax
import jax.numpy as jnp
import numpy as np
from jax.experimental import pallas as pl
from jax.experimental.pallas import tpu as pltpu

_VMEM_LIMIT = 32 * 1024 * 1024   # conservative: <= 1/2 of v7x's 64 MiB VMEM


# ----------------------------------------------------------------------------
# Kernel 1: per-batch K / V projection (full-width matmuls), K stored
# transposed + lane-dense so the attention kernel never relayouts it.
# ----------------------------------------------------------------------------
def _kv_proj_kernel(k_ref, v_ref, wk_ref, wv_ref, bk_ref, bv_ref,
                    kT_ref, vp_ref):
    """k_ref / v_ref: [1, S, E];  wk/wv: [E, E] ([in, out]);  bk/bv: [1, E].

    Outputs: kT_ref [1, E, S] (K^T, lane-dense in S), vp_ref [1, S, E].
    """
    xk = k_ref[0]                                                    # [S, E]
    xv = v_ref[0]                                                    # [S, E]
    kk = jnp.dot(xk, wk_ref[...], preferred_element_type=jnp.float32) \
        + bk_ref[...]                                                # [S, E]
    vv = jnp.dot(xv, wv_ref[...], preferred_element_type=jnp.float32) \
        + bv_ref[...]                                                # [S, E]
    # One transpose per batch element (XLU); every query tile then consumes
    # plain row-major [D, S] sublane slices.
    kT_ref[0] = jnp.transpose(kk).astype(kT_ref.dtype)              # [E, S]
    vp_ref[0] = vv.astype(vp_ref.dtype)                             # [S, E]


def _kv_project(k_ble, v_ble, wk_t, wv_t, bk_s, bv_s):
    B, S, E = k_ble.shape
    cdt = k_ble.dtype
    kv_spec = pl.BlockSpec((1, S, E), lambda b: (b, 0, 0))
    w_spec = pl.BlockSpec((E, E), lambda b: (0, 0))
    b_spec = pl.BlockSpec((1, E), lambda b: (0, 0))
    kT, vp = pl.pallas_call(
        _kv_proj_kernel,
        out_shape=(jax.ShapeDtypeStruct((B, E, S), cdt),
                   jax.ShapeDtypeStruct((B, S, E), cdt)),
        grid_spec=pltpu.PrefetchScalarGridSpec(
            num_scalar_prefetch=0,
            grid=(B,),
            in_specs=[kv_spec, kv_spec, w_spec, w_spec, b_spec, b_spec],
            out_specs=[pl.BlockSpec((1, E, S), lambda b: (b, 0, 0)),
                       pl.BlockSpec((1, S, E), lambda b: (b, 0, 0))],
        ),
        compiler_params=pltpu.CompilerParams(
            dimension_semantics=("parallel",),
            vmem_limit_bytes=_VMEM_LIMIT),
    )(k_ble, v_ble, wk_t, wv_t, bk_s, bv_s)
    return kT, vp


# ----------------------------------------------------------------------------
# Kernel 2: fused Q projection + per-head attention + fused output projection
# + residual.  Grid = (batch, query-tile); both axes carry no state ->
# "parallel" (v7x megacore can split query tiles even at B=1).
# ----------------------------------------------------------------------------
def _attn_kernel(num_heads, head_dim,
                 q_ref, id_ref, kT_ref, v_ref,
                 wq_ref, wo_ref, bq_ref, bo_ref,
                 out_ref,
                 o_scr):
    """Per grid step:
      q_ref / id_ref : [1, tq, E]  query / residual tile (compute dtype)
      kT_ref         : [1, E, S]   projected K^T of this batch element
      v_ref          : [1, S, E]   projected V of this batch element
      wq_ref / wo_ref: [E, E]      [in, out] layout (softmax scale in wq)
      bq_ref / bo_ref: [1, E]      f32
      o_scr          : [tq, E]     VMEM staging for concatenated head outputs
    """
    H, D = num_heads, head_dim
    xq = q_ref[0]                                                    # [tq, E]
    cdt = xq.dtype

    # Fused Q projection: one full-width [tq,E]@[E,E] matmul per tile.
    q = (jnp.dot(xq, wq_ref[...], preferred_element_type=jnp.float32)
         + bq_ref[...]).astype(cdt)                                  # [tq, E]

    # Per-head attention.  Static unroll: each head's temporaries end at the
    # o_scr store (no carried register accumulator), which keeps live ranges
    # bounded without needing dynamic lane offsets inside a fori_loop.
    for h in range(H):
        qh = q[:, h * D:(h + 1) * D]                        # [tq, D] lanes
        khT = kT_ref[0, h * D:(h + 1) * D, :]               # [D, S] sublanes
        vh = v_ref[0, :, h * D:(h + 1) * D]                 # [S, D]

        s = jnp.dot(qh, khT, preferred_element_type=jnp.float32)    # [tq, S]
        s = s - jnp.max(s, axis=-1, keepdims=True)
        p = jnp.exp(s)
        inv = pl.reciprocal(jnp.sum(p, axis=-1, keepdims=True), approx=True)
        oh = jnp.dot(p.astype(cdt), vh,
                     preferred_element_type=jnp.float32) * inv       # [tq, D]
        o_scr[:, h * D:(h + 1) * D] = oh.astype(cdt)

    # Fused output projection: a single full-depth [tq,E]@[E,E] matmul.
    out = (jnp.dot(o_scr[...], wo_ref[...], preferred_element_type=jnp.float32)
           + bo_ref[...] + id_ref[0].astype(jnp.float32))
    out_ref[0] = out.astype(out_ref.dtype)


# ----------------------------------------------------------------------------
# Host-side parameter preparation.
# ----------------------------------------------------------------------------
def _prepare_params(params, num_heads, compute_dtype):
    """Transpose to [in, out], fold softmax scale into Wq/bq, cast weights to
    the activation compute dtype (biases stay f32)."""
    wq, wk, wv, bq, bk, bv, wo, bo = params       # torch layout: W [out, in]
    E = wq.shape[0]
    assert E % num_heads == 0, "embed_dims must be divisible by num_heads"
    D = E // num_heads
    scale = 1.0 / math.sqrt(D)

    wq_t = (jnp.transpose(wq) * scale).astype(compute_dtype)   # [E, E]
    wk_t = jnp.transpose(wk).astype(compute_dtype)
    wv_t = jnp.transpose(wv).astype(compute_dtype)
    wo_t = jnp.transpose(wo).astype(compute_dtype)
    bq_s = (bq.reshape(1, E) * scale).astype(jnp.float32)
    bk_s = bk.reshape(1, E).astype(jnp.float32)
    bv_s = bv.reshape(1, E).astype(jnp.float32)
    bo_s = bo.reshape(1, E).astype(jnp.float32)
    return wq_t, wk_t, wv_t, wo_t, bq_s, bk_s, bv_s, bo_s


def _mha_pallas(q_ble, k_ble, v_ble, id_ble, prepared, num_heads):
    """q_ble / id_ble: [B, L, E]; k_ble / v_ble: [B, S, E] (batch-major)."""
    B, L, E = q_ble.shape
    S = k_ble.shape[1]
    D = E // num_heads
    cdt = q_ble.dtype
    wq_t, wk_t, wv_t, wo_t, bq_s, bk_s, bv_s, bo_s = prepared

    # Stage 1: project K / V once per batch element (K stored transposed).
    kT, vp = _kv_project(k_ble, v_ble, wk_t, wv_t, bk_s, bv_s)

    # Query tiling: whole L when small, 256-row tiles otherwise (padded rows
    # are independent of real rows and are sliced off after the call).
    if L <= 256:
        tq, n_lt, Lp = L, 1, L
    else:
        tq = 256
        n_lt = pl.cdiv(L, tq)
        Lp = n_lt * tq
    if Lp != L:
        pad = ((0, 0), (0, Lp - L), (0, 0))
        q_ble = jnp.pad(q_ble, pad)
        id_ble = jnp.pad(id_ble, pad)

    q_spec = pl.BlockSpec((1, tq, E), lambda b, l: (b, l, 0))
    kT_spec = pl.BlockSpec((1, E, S), lambda b, l: (b, 0, 0))
    v_spec = pl.BlockSpec((1, S, E), lambda b, l: (b, 0, 0))
    w_spec = pl.BlockSpec((E, E), lambda b, l: (0, 0))
    b_spec = pl.BlockSpec((1, E), lambda b, l: (0, 0))

    out = pl.pallas_call(
        functools.partial(_attn_kernel, num_heads, D),
        out_shape=jax.ShapeDtypeStruct((B, Lp, E), cdt),
        grid_spec=pltpu.PrefetchScalarGridSpec(
            num_scalar_prefetch=0,
            grid=(B, n_lt),
            in_specs=[q_spec, q_spec, kT_spec, v_spec,
                      w_spec, w_spec, b_spec, b_spec],
            out_specs=q_spec,
            scratch_shapes=[pltpu.VMEM((tq, E), cdt)],
        ),
        compiler_params=pltpu.CompilerParams(
            dimension_semantics=("parallel", "parallel"),
            vmem_limit_bytes=_VMEM_LIMIT),
    )(q_ble, id_ble, kT, vp, wq_t, wo_t, bq_s, bo_s)

    return out[:, :L, :] if Lp != L else out


def multihead_attention_forward(query, params, num_heads,
                                key=None, value=None, identity=None,
                                query_pos=None, key_pos=None):
    """Mirrors MultiheadAttention.forward with batch_first=False.

    query: [L, B, E]   (num_queries, bs, embed_dims)
    Returns: [L, B, E]
    """
    if key is None:
        key = query
    if value is None:
        value = key
    if identity is None:
        identity = query
    if key_pos is None and query_pos is not None and query_pos.shape == key.shape:
        key_pos = query_pos
    q = query + query_pos if query_pos is not None else query
    k = key + key_pos if key_pos is not None else key
    v = value

    prepared = _prepare_params(params, num_heads, q.dtype)

    # [L, B, E] -> [B, L, E] for the kernels, and back (layout glue only).
    to_bm = lambda x: jnp.transpose(x, (1, 0, 2))
    out_ble = _mha_pallas(to_bm(q), to_bm(k), to_bm(v), to_bm(identity),
                          prepared, num_heads)
    return jnp.transpose(out_ble, (1, 0, 2))


# ----------------------------------------------------------------------------
# Pure-jnp reference + test harness.
# ----------------------------------------------------------------------------
def _reference_forward(query, params, num_heads, query_pos):
    """Pure-jnp reference replicating nn.MultiheadAttention semantics."""
    wq, wk, wv, bq, bk, bv, wo, bo = params
    L, B, E = query.shape
    D = E // num_heads
    key = query
    value = key
    identity = query
    key_pos = query_pos
    q = query + query_pos
    k = key + key_pos
    v = value

    def one_batch(qb, kb, vb):  # [L, E]
        Q = qb @ wq.T + bq[0]
        K = kb @ wk.T + bk[0]
        V = vb @ wv.T + bv[0]
        Qh = Q.reshape(L, num_heads, D).transpose(1, 0, 2)
        Kh = K.reshape(L, num_heads, D).transpose(1, 0, 2)
        Vh = V.reshape(L, num_heads, D).transpose(1, 0, 2)
        s = jnp.einsum('hld,hsd->hls', Qh, Kh) / math.sqrt(D)
        p = jax.nn.softmax(s, axis=-1)
        o = jnp.einsum('hls,hsd->hld', p, Vh).transpose(1, 0, 2).reshape(L, E)
        return o @ wo.T + bo[0]

    outs = jax.vmap(one_batch, in_axes=(1, 1, 1), out_axes=1)(q, k, v)
    return identity + outs


def init_params(key, embed_dims):
    ks = jax.random.split(key, 8)
    s = 1.0 / math.sqrt(embed_dims)
    E = embed_dims
    wq = jax.random.normal(ks[0], (E, E), jnp.float32) * s
    wk = jax.random.normal(ks[1], (E, E), jnp.float32) * s
    wv = jax.random.normal(ks[2], (E, E), jnp.float32) * s
    bq = jax.random.normal(ks[3], (1, E), jnp.float32) * 0.02
    bk = jax.random.normal(ks[4], (1, E), jnp.float32) * 0.02
    bv = jax.random.normal(ks[5], (1, E), jnp.float32) * 0.02
    wo = jax.random.normal(ks[6], (E, E), jnp.float32) * s
    bo = jax.random.normal(ks[7], (1, E), jnp.float32) * 0.02
    return (wq, wk, wv, bq, bk, bv, wo, bo)


if __name__ == "__main__":
    # Small shapes: num_queries=8, batch=2, embed_dims=32, num_heads=4
    L, B, E, H = 8, 2, 32, 4

    root = jax.random.PRNGKey(0)
    k_param, k_q, k_pos = jax.random.split(root, 3)
    params = init_params(k_param, E)

    query = jax.random.normal(k_q, (L, B, E), jnp.float32)        # [L, B, E]
    query_pos = jax.random.normal(k_pos, (L, B, E), jnp.float32)  # [L, B, E]

    out = multihead_attention_forward(query, params, H, query_pos=query_pos)
    out = jax.block_until_ready(out)

    ref = _reference_forward(query, params, H, query_pos)
    # Tolerance is loose enough to absorb the approximate (EUP) reciprocal in
    # the softmax normalization while still catching any structural bug.
    np.testing.assert_allclose(np.asarray(out), np.asarray(ref),
                               rtol=1e-2, atol=1e-2)
    assert out.shape == (L, B, E)
    print("KERNEL_OK")
</pallas_src>

<mosaic_0001>
module attributes {stable_mosaic.version = 11 : i64} {
  func.func @_kv_proj_kernel(%arg0: i32, %arg1: memref<1x8x32xf32, #tpu.memory_space<vmem>>, %arg2: memref<1x8x32xf32, #tpu.memory_space<vmem>>, %arg3: memref<32x32xf32, #tpu.memory_space<vmem>>, %arg4: memref<32x32xf32, #tpu.memory_space<vmem>>, %arg5: memref<1x32xf32, #tpu.memory_space<vmem>>, %arg6: memref<1x32xf32, #tpu.memory_space<vmem>>, %arg7: memref<1x32x8xf32, #tpu.memory_space<vmem>>, %arg8: memref<1x8x32xf32, #tpu.memory_space<vmem>>) attributes {dimension_semantics = [#tpu.dimension_semantics<parallel>], iteration_bounds = array<i64: 2>, scalar_prefetch = 0 : i64, scratch_operands = 0 : i64, tpu.core_type = #tpu.core_type<tc>, window_params = [{transform_indices = @transform_0, window_bounds = array<i64: 1, 8, 32>}, {transform_indices = @transform_1, window_bounds = array<i64: 1, 8, 32>}, {pipeline_mode = #tpu.pipeline_mode<synchronous>, transform_indices = @transform_2, window_bounds = array<i64: 32, 32>}, {pipeline_mode = #tpu.pipeline_mode<synchronous>, transform_indices = @transform_3, window_bounds = array<i64: 32, 32>}, {pipeline_mode = #tpu.pipeline_mode<synchronous>, transform_indices = @transform_4, window_bounds = array<i64: 1, 32>}, {pipeline_mode = #tpu.pipeline_mode<synchronous>, transform_indices = @transform_5, window_bounds = array<i64: 1, 32>}, {transform_indices = @transform_6, window_bounds = array<i64: 1, 32, 8>}, {transform_indices = @transform_7, window_bounds = array<i64: 1, 8, 32>}]} {
    %c0 = arith.constant 0 : index
    %c0_0 = arith.constant 0 : index
    %c0_1 = arith.constant 0 : index
    %0 = vector.load %arg1[%c0, %c0_0, %c0_1] : memref<1x8x32xf32, #tpu.memory_space<vmem>>, vector<1x8x32xf32>
    %1 = vector.shape_cast %0 : vector<1x8x32xf32> to vector<8x32xf32>
    %c0_2 = arith.constant 0 : index
    %c0_3 = arith.constant 0 : index
    %c0_4 = arith.constant 0 : index
    %2 = vector.load %arg2[%c0_2, %c0_3, %c0_4] : memref<1x8x32xf32, #tpu.memory_space<vmem>>, vector<1x8x32xf32>
    %3 = vector.shape_cast %2 : vector<1x8x32xf32> to vector<8x32xf32>
    %c0_5 = arith.constant 0 : index
    %c0_6 = arith.constant 0 : index
    %4 = vector.load %arg3[%c0_5, %c0_6] : memref<32x32xf32, #tpu.memory_space<vmem>>, vector<32x32xf32>
    %cst = arith.constant dense<0.000000e+00> : vector<8x32xf32>
    %5 = tpu.matmul %1, %4, %cst {dimension_numbers = #tpu.dot_dimension_numbers<[1], [0], [0], [1], [0, 0, 1, 1], [], []>} : vector<8x32xf32>, vector<32x32xf32>, vector<8x32xf32> -> vector<8x32xf32>
    %c0_7 = arith.constant 0 : index
    %c0_8 = arith.constant 0 : index
    %6 = vector.load %arg5[%c0_7, %c0_8] : memref<1x32xf32, #tpu.memory_space<vmem>>, vector<1x32xf32>
    %7 = vector.broadcast %6 : vector<1x32xf32> to vector<8x32xf32>
    %8 = arith.addf %5, %7 : vector<8x32xf32>
    %c0_9 = arith.constant 0 : index
    %c0_10 = arith.constant 0 : index
    %9 = vector.load %arg4[%c0_9, %c0_10] : memref<32x32xf32, #tpu.memory_space<vmem>>, vector<32x32xf32>
    %cst_11 = arith.constant dense<0.000000e+00> : vector<8x32xf32>
    %10 = tpu.matmul %3, %9, %cst_11 {dimension_numbers = #tpu.dot_dimension_numbers<[1], [0], [0], [1], [0, 0, 1, 1], [], []>} : vector<8x32xf32>, vector<32x32xf32>, vector<8x32xf32> -> vector<8x32xf32>
    %c0_12 = arith.constant 0 : index
    %c0_13 = arith.constant 0 : index
    %11 = vector.load %arg6[%c0_12, %c0_13] : memref<1x32xf32, #tpu.memory_space<vmem>>, vector<1x32xf32>
    %12 = vector.broadcast %11 : vector<1x32xf32> to vector<8x32xf32>
    %13 = arith.addf %10, %12 : vector<8x32xf32>
    %14 = tpu.transpose %8, [1, 0] : vector<8x32xf32> -> vector<32x8xf32>
    %c0_14 = arith.constant 0 : index
    %c0_15 = arith.constant 0 : index
    %c0_16 = arith.constant 0 : index
    %15 = vector.load %arg7[%c0_14, %c0_15, %c0_16] : memref<1x32x8xf32, #tpu.memory_space<vmem>>, vector<1x32x8xf32>
    %16 = vector.shape_cast %15 : vector<1x32x8xf32> to vector<32x8xf32>
    %17 = vector.shape_cast %14 : vector<32x8xf32> to vector<1x32x8xf32>
    tpu.vector_store %arg7[%c0_14, %c0_15, %c0_16], %17 {strides = array<i32>} : memref<1x32x8xf32, #tpu.memory_space<vmem>>, vector<1x32x8xf32>,
    %c0_17 = arith.constant 0 : index
    %c0_18 = arith.constant 0 : index
    %c0_19 = arith.constant 0 : index
    %18 = vector.load %arg8[%c0_17, %c0_18, %c0_19] : memref<1x8x32xf32, #tpu.memory_space<vmem>>, vector<1x8x32xf32>
    %19 = vector.shape_cast %18 : vector<1x8x32xf32> to vector<8x32xf32>
    %20 = vector.shape_cast %13 : vector<8x32xf32> to vector<1x8x32xf32>
    tpu.vector_store %arg8[%c0_17, %c0_18, %c0_19], %20 {strides = array<i32>} : memref<1x8x32xf32, #tpu.memory_space<vmem>>, vector<1x8x32xf32>,
    return
  }
  func.func @transform_0(%arg0: i32) -> (i32, i32, i32) {
    %c0_i32 = arith.constant 0 : i32
    %c0_i32_0 = arith.constant 0 : i32
    %c0_i32_1 = arith.constant 0 : i32
    return %arg0, %c0_i32, %c0_i32_0 : i32, i32, i32
  }
  func.func @transform_1(%arg0: i32) -> (i32, i32, i32) {
    %c0_i32 = arith.constant 0 : i32
    %c0_i32_0 = arith.constant 0 : i32
    %c0_i32_1 = arith.constant 0 : i32
    return %arg0, %c0_i32, %c0_i32_0 : i32, i32, i32
  }
  func.func @transform_2(%arg0: i32) -> (i32, i32) {
    %c0_i32 = arith.constant 0 : i32
    %c0_i32_0 = arith.constant 0 : i32
    %c0_i32_1 = arith.constant 0 : i32
    return %c0_i32, %c0_i32_0 : i32, i32
  }
  func.func @transform_3(%arg0: i32) -> (i32, i32) {
    %c0_i32 = arith.constant 0 : i32
    %c0_i32_0 = arith.constant 0 : i32
    %c0_i32_1 = arith.constant 0 : i32
    return %c0_i32, %c0_i32_0 : i32, i32
  }
  func.func @transform_4(%arg0: i32) -> (i32, i32) {
    %c0_i32 = arith.constant 0 : i32
    %c0_i32_0 = arith.constant 0 : i32
    %c0_i32_1 = arith.constant 0 : i32
    return %c0_i32, %c0_i32_0 : i32, i32
  }
  func.func @transform_5(%arg0: i32) -> (i32, i32) {
    %c0_i32 = arith.constant 0 : i32
    %c0_i32_0 = arith.constant 0 : i32
    %c0_i32_1 = arith.constant 0 : i32
    return %c0_i32, %c0_i32_0 : i32, i32
  }
  func.func @transform_6(%arg0: i32) -> (i32, i32, i32) {
    %c0_i32 = arith.constant 0 : i32
    %c0_i32_0 = arith.constant 0 : i32
    %c0_i32_1 = arith.constant 0 : i32
    return %arg0, %c0_i32, %c0_i32_0 : i32, i32, i32
  }
  func.func @transform_7(%arg0: i32) -> (i32, i32, i32) {
    %c0_i32 = arith.constant 0 : i32
    %c0_i32_0 = arith.constant 0 : i32
    %c0_i32_1 = arith.constant 0 : i32
    return %arg0, %c0_i32, %c0_i32_0 : i32, i32, i32
  }
}

</mosaic_0001>

<bundles_post_ra>
// kernel: tpu_custom_call.1
= control target key start
LH: loop header
LB: loop body
LE: loop exit
PB: predicated region body
PF: predicated region fallthrough
CT: control target
= control target key end

     0   :  { %s1417_s0 = inlined_call_operand.hbm [shape: f32[2,8,32], index: 0, kind: input, shape index: {}]   ;;  %s1418_s1 = inlined_call_operand.hbm [shape: f32[2,8,32], index: 1, kind: input, shape index: {}]   ;;  %s1419_s2 = inlined_call_operand.hbm [shape: f32[32,32], index: 2, kind: input, shape index: {}]   ;;  %s1420_s3 = inlined_call_operand.hbm [shape: f32[32,32], index: 3, kind: input, shape index: {}]   ;;  %s1421_s4 = inlined_call_operand.vmem [shape: f32[1,32], index: 4, kind: input, shape index: {}]   ;;  %s1422_s5 = inlined_call_operand.vmem [shape: f32[1,32], index: 5, kind: input, shape index: {}]   ;;  %s1423_s6 = inlined_call_operand.vmem [shape: f32[2,32,8], index: 6, kind: output, shape index: {0}]   ;;  %s1424_s7 = inlined_call_operand.hbm [shape: f32[2,8,32], index: 7, kind: output, shape index: {1}]  }
   0x1   :  { %1430 = sst [smem:[#allocation18_spill]] %s1419_s2 }
   0x2   :  { %1431 = sst [smem:[#allocation19_spill]] %s1420_s3 }
   0x3   :  { %13 = vsyncpa [#allocation3], 0 }
   0x4   :  { %15 = vsyncpa [#allocation3 + $0x1], 0 }
   0x5   :  { %16 = vsyncpa [#allocation6], 0 }
   0x6   :  { %18 = vsyncpa [#allocation6 + $0x1], 0 }
   0x7   :  { %19 = vsyncpa [#allocation9], 0 }
   0x8   :  { %20 = vsyncpa [#allocation4], 0 }
   0x9   :  { %22 = vsyncpa [#allocation4 + $0x1], 0  ;;  %s1134_s24 = smov 0   ;;  %s1136_s25 = smov 0  }
   0xa   :  { %s1138_s26 = smov 0   ;;  %s1140_s27 = smov 0  }
   0xb LB: > { %1432 = sst [smem:[#allocation16_spill]] %s1078_s26  ;;  %s1155_s28 = sadd.s32 4294967295, %s1082_s27   ;;  %s1082_s27 = sphi %s1140_s27, %s1457_s27   ;;  %s1078_s26 = sphi %s1138_s26, %s1456_s26   ;;  %s1074_s25 = sphi %s1136_s25, %s1455_s25   ;;  %s1070_s24 = sphi %s1134_s24, %s1454_s24  }
   0xc   : > { %s741_s29 = sadd.s32 4294967294, %s1082_s27   ;;  %p48_p0 = scmp.ne.s32.totalorder %s1074_s25, %s1070_s24 }
   0xd   : > { %p1425_p1 = scmp.eq.s32.totalorder %s1155_s28, 0  ;;  %p214_p3 = scmp.eq.s32.totalorder %s741_s29, 1 }
   0xe   : > { %p742_p5 = scmp.ge.s32.totalorder %s1082_s27, 1  ;;  %p221_p7 = scmp.lt.s32.totalorder %s1082_s27, 3 }
   0xf   : > { %p1164_p4 = por %p1425_p1, %p48_p0  ;;  %p1169_p6 = por %p214_p3, %p48_p0 }
  0x10   : > { %p1174_p8 = pnand %p742_p5, %p221_p7  ;;  %s1084_s10 = smov [#allocation7]  }
  0x11   : > { %s1433_s30 = scalar_select %p1164_p4, 1, 0 }
  0x12   : > { %s1434_s8 = scalar_select %p1169_p6, 1, 0 }
  0x13   : > { %s1435_s9 = scalar_select %p1174_p8, 1, 0 }
  0x14   : > { %s233_s11 = sshll.u32 %s1084_s10, 4  ;;  %p825_p9 = pneg %p1174_p8  ;;  %s1178_s11 = int_to_ptr.vmem [resolvable:$true] %s233_s11 }
  0x15   : > { %s1085_s13 = smov [#allocation8]   ;;  %s1437_s2 = sld [smem:[#allocation18_spill]] }
  0x16   : > { %p1185_p11 = pnand %p825_p9, %p1425_p1  ;;  %s246_s14 = sshll.u32 %s1085_s13, 4  ;;  %s1189_s14 = int_to_ptr.vmem [resolvable:$true] %s246_s14 }
  0x18   : > { %p890_p13 = pneg %p1185_p11 }
  0x1b   : > { %s888_s17 = scalar_lea.hbm %s1437_s2, 512 }
  0x1c   : > { %p889_p12 = scmp.ne.s32.totalorder %s1437_s2, %s888_s17  ;;  %p895_p5 = scmp.lt.u32.totalorder %s888_s17, %s1437_s2 }
  0x1e   : > { %p891_p0 = pnand %p890_p13, %p889_p12 }
  0x20   : > { %p892_p3 = pneg %p891_p0 }
  0x22   : > { %p897_p7 = pnand %p895_p5, %p892_p3 }
  0x24   : > { %900 = shalt.err (!%p897_p7)
}
  0x25   : > { %s901_s22 = scalar_lea.vmem %s1178_s11, 512  ;;  %p909_p2 = scmp.lt.s32.totalorder %s1178_s11, %s1178_s11 }
  0x26   : > { %p902_p9 = scmp.ne.s32.totalorder %s1178_s11, %s901_s22  ;;  %p910_p12 = scmp.lt.s32.totalorder %s901_s22, %s901_s22 }
  0x28   : > { %p904_p10 = pnand %p902_p9, %p890_p13  ;;  %p911_p0 = por %p910_p12, %p909_p2 }
  0x2a   : > { %p905_p1 = pneg %p904_p10 }
  0x2c   : > { %p912_p6 = pnand %p911_p0, %p905_p1 }
  0x2e   : > { %915 = shalt.err (!%p912_p6)
}
  0x2f   : > { %s1086_s23 = smov 128   ;;  %s1087_s29 = smov 8  }
  0x30   : > { %828 = dma.hbm_to_vmem [thread:$0]  (!%p1185_p11), %s1437_s2, 512, %s1178_s11, [#allocation6], %s1086_s23, %s1086_s23, %s1087_s29  }
  0x31   : > { %s1438_s3 = sld [smem:[#allocation19_spill]] }
  0x37   : > { %s916_s17 = scalar_lea.hbm %s1438_s3, 512 }
  0x38   : > { %p917_p2 = scmp.ne.s32.totalorder %s1438_s3, %s916_s17  ;;  %p923_p10 = scmp.lt.u32.totalorder %s916_s17, %s1438_s3 }
  0x3a   : > { %p919_p1 = pnand %p917_p2, %p890_p13 }
  0x3c   : > { %p920_p6 = pneg %p919_p1 }
  0x3e   : > { %p925_p3 = pnand %p923_p10, %p920_p6 }
  0x40   : > { %928 = shalt.err (!%p925_p3)
}
  0x41   : > { %s929_s11 = scalar_lea.vmem %s1189_s14, 512  ;;  %p937_p12 = scmp.lt.s32.totalorder %s1189_s14, %s1189_s14 }
  0x42   : > { %p930_p5 = scmp.ne.s32.totalorder %s1189_s14, %s929_s11  ;;  %p938_p0 = scmp.lt.s32.totalorder %s929_s11, %s929_s11 }
  0x44   : > { %p932_p7 = pnand %p930_p5, %p890_p13  ;;  %p939_p2 = por %p938_p0, %p937_p12 }
  0x46   : > { %p933_p9 = pneg %p932_p7 }
  0x48   : > { %p940_p1 = pnand %p939_p2, %p933_p9 }
  0x4a   : > { %943 = shalt.err (!%p940_p1)
}
  0x4b   : > { %831 = dma.hbm_to_vmem [thread:$0]  (!%p1185_p11), %s1438_s3, 512, %s1189_s14, [#allocation9], %s1086_s23, %s1086_s23, %s1087_s29  }
  0x4c   : > { %s1244_s13 = sadd.s32 1, %s1082_s27   ;;  %s35_s12 = sadd.s32 1, %s1078_s26 }
  0x4d   : > { %s32_s15 = ssub.s32 %s1082_s27, %s1244_s13  ;;  %p42_p13 = scmp.ne.s32.totalorder %s1078_s26, %s1074_s25 }
  0x4e   : > { %p33_p6 = scmp.eq.s32.totalorder %s32_s15, 0  ;;  %p43_p10 = scmp.eq.s32.totalorder %s1082_s27, 0 }
  0x4f   : > { %p1439_p3 = scmp.eq.s32.totalorder %s1155_s28, 1  ;;  %p845_p7 = scmp.lt.s32.totalorder %s1082_s27, 2 }
  0x50   : > { %s1260_s17 = scalar_select %p33_p6, %s1078_s26, %s35_s12  }
  0x51   : > { %p1254_p5 = por %p1439_p3, %p42_p13  ;;  %p44_p9 = por %p43_p10, %p42_p13 }
  0x52   : > { %1441 = sst [smem:[#allocation17_spill]] %s1260_s17  ;;  %s266_s18 = sand.u32 1, %s1078_s26  }
  0x53   : > { %s1440_s16 = scalar_select %p1254_p5, 1, 0 }
  0x54   : > { %s1263_s14 = sshll.u32 %s266_s18, 3  ;;  %s747_s23 = sshll.u32 %s1082_s27, 7 }
  0x55   : > { %s1269_s20 = scalar_lea.hbm %s1417_s0, %s747_s23  ;;  %s270_s21 = scalar_lea.vmem [#allocation2], %s1263_s14 }
  0x56   : > { %s277_s11 = sshll.u32 %s270_s21, 4  ;;  %p1274_p11 = pnand %p845_p7, %p44_p9  ;;  %s1272_s11 = int_to_ptr.vmem [resolvable:$true] %s277_s11 }
  0x57   : > { %s1281_s15 = scalar_lea.hbm %s1418_s1, %s747_s23  ;;  %s284_s29 = sand.u32 1, %s1082_s27  }
  0x58   : > { %s267_s19 = scalar_lea.sflag [#allocation3], %s266_s18  ;;  %s944_s2 = scalar_lea.hbm %s1269_s20, 128 }
  0x59   : > { %p945_p12 = scmp.ne.s32.totalorder %s1269_s20, %s944_s2  ;;  %p946_p0 = pneg %p1274_p11 }
  0x5a   : > { %s949_s17 = scalar_lea.hbm %s1417_s0, 256  ;;  %p950_p13 = scmp.lt.u32.totalorder %s1269_s20, %s1417_s0 }
  0x5b   : > { %p947_p2 = pnand %p946_p0, %p945_p12  ;;  %p951_p6 = scmp.lt.u32.totalorder %s949_s17, %s944_s2 }
  0x5c   : > { %p953_p3 = scmp.lt.u32.totalorder %s944_s2, %s1269_s20 }
  0x5d   : > { %p948_p1 = pneg %p947_p2  ;;  %p952_p10 = por %p951_p6, %p950_p13 }
  0x5f   : > { %p954_p7 = por %p953_p3, %p952_p10 }
  0x61   : > { %p955_p9 = pnand %p954_p7, %p948_p1 }
  0x63   : > { %958 = shalt.err (!%p955_p9)
}
  0x64   : > { %s959_s18 = scalar_lea.vmem %s1272_s11, 128  ;;  %s1088_s3 = smov [#allocation2]  }
  0x65   : > { %p960_p12 = scmp.ne.s32.totalorder %s1272_s11, %s959_s18  ;;  %s964_s23 = sshll.u32 %s1088_s3, 4  ;;  %s965_s23 = int_to_ptr.vmem [resolvable:$false] %s964_s23 }
  0x66   : > { %s966_s26 = scalar_lea.vmem %s965_s23, 256  ;;  %p967_p4 = scmp.lt.s32.totalorder %s1272_s11, %s965_s23 }
  0x67   : > { %p962_p2 = pnand %p960_p12, %p946_p0  ;;  %p968_p13 = scmp.lt.s32.totalorder %s966_s26, %s959_s18 }
  0x69   : > { %p963_p5 = pneg %p962_p2  ;;  %p969_p6 = por %p968_p13, %p967_p4 }
  0x6b   : > { %p970_p10 = pnand %p969_p6, %p963_p5 }
  0x6d   : > { %973 = shalt.err (!%p970_p10)
}
  0x6e   : > { %835 = dma.hbm_to_vmem [thread:$0]  (!%p1274_p11), %s1269_s20, 128, %s1272_s11, %s267_s19  }
  0x6f   : > { %s288_s2 = scalar_lea.vmem [#allocation5], %s1263_s14  ;;  %s285_s12 = scalar_lea.sflag [#allocation6], %s284_s29 }
  0x70   : > { %s295_s17 = sshll.u32 %s288_s2, 4  ;;  %s974_s21 = scalar_lea.hbm %s1281_s15, 128  ;;  %s296_s17 = int_to_ptr.vmem [resolvable:$true] %s295_s17 }
  0x71   : > { %p975_p4 = scmp.ne.s32.totalorder %s1281_s15, %s974_s21  ;;  %s979_s3 = scalar_lea.hbm %s1418_s1, 256 }
  0x72   : > { %p980_p3 = scmp.lt.u32.totalorder %s1281_s15, %s1418_s1  ;;  %p981_p7 = scmp.lt.u32.totalorder %s979_s3, %s974_s21 }
  0x73   : > { %p977_p5 = pnand %p975_p4, %p946_p0  ;;  %p983_p12 = scmp.lt.u32.totalorder %s974_s21, %s1281_s15 }
  0x74   : > { %p982_p9 = por %p981_p7, %p980_p3 }
  0x75   : > { %p978_p1 = pneg %p977_p5 }
  0x76   : > { %p984_p2 = por %p983_p12, %p982_p9 }
  0x78   : > { %p985_p13 = pnand %p984_p2, %p978_p1 }
  0x7a   : > { %988 = shalt.err (!%p985_p13)
}
  0x7b   : > { %s989_s14 = scalar_lea.vmem %s296_s17, 128  ;;  %s1089_s20 = smov [#allocation5]  }
  0x7c   : > { %p990_p6 = scmp.ne.s32.totalorder %s296_s17, %s989_s14  ;;  %s994_s11 = sshll.u32 %s1089_s20, 4  ;;  %s995_s11 = int_to_ptr.vmem [resolvable:$false] %s994_s11 }
  0x7d   : > { %s996_s29 = scalar_lea.vmem %s995_s11, 256  ;;  %p997_p5 = scmp.lt.s32.totalorder %s296_s17, %s995_s11 }
  0x7e   : > { %p992_p10 = pnand %p990_p6, %p946_p0  ;;  %p998_p8 = scmp.lt.s32.totalorder %s996_s29, %s989_s14 }
  0x80   : > { %p993_p4 = pneg %p992_p10  ;;  %p999_p3 = por %p998_p8, %p997_p5 }
  0x82   : > { %p1000_p7 = pnand %p999_p3, %p993_p4 }
  0x84   : > { %1003 = shalt.err (!%p1000_p7)
}
  0x85   : > { %838 = dma.hbm_to_vmem [thread:$0]  (!%p1274_p11), %s1281_s15, 128, %s296_s17, %s285_s12  }
  0x86   : > { %p1443_p1 = scmp.ne.s32.totalorder %s1435_s9, 0 }
  0x87   : > { %s1334_s19 = sand.u32 (!%p1443_p1), 1, %s1074_s25   ;;  %p1444_p8 = scmp.ne.s32.totalorder (!%p1443_p1), %s1433_s30, 0 }
  0x88   : > { %304 = sbr.rel (%p1443_p1) target bundleno = 521 (0x209), region = 44  ;;  %s1337_s2 = sshll.u32 (!%p1443_p1), %s1334_s19, 3 }
  0x89   : > { %s307_s21 = scalar_lea.sflag (!%p1443_p1), [#allocation3], %s1334_s19  ;;  %s310_s10 = scalar_lea.vmem (!%p1443_p1), [#allocation2], %s1337_s2 }
  0x8f   : > { %1049 = dma.done.wait (%p1444_p8), %s307_s21, 128  }
  0x90   : > { %1051 = vsyncadd (%p1444_p8), %s307_s21, 4294967168  ;;  %s315_s9 = sand.u32 1, %s1155_s28   ;;  %s319_s15 = scalar_lea.vmem [#allocation5], %s1337_s2 }
  0x91   : > { %s316_s22 = scalar_lea.sflag [#allocation6], %s315_s9 }
  0x92   : > { %1053 = dma.done.wait (%p1444_p8), %s316_s22, 128  }
  0x93   : > { %1055 = vsyncadd (%p1444_p8), %s316_s22, 4294967168  ;;  %p1445_p11 = scmp.eq.s32.totalorder %s1155_s28, 0 }
  0x95   : > { %1057 = dma.done.wait (%p1445_p11), [#allocation6], 512   ;;  %p1446_p0 = pmov %p1445_p11 }
  0x97   : > { %1059 = vsyncadd (%p1446_p0), [#allocation6], 4294966784  ;;  %p1447_p9 = pmov %p1446_p0 }
  0x98   : > { %p1448_p12 = pmov %p1446_p0 }
  0x99   : > { %1061 = dma.done.wait (%p1447_p9), [#allocation9], 512  }
  0x9a   : > { %1063 = vsyncadd (%p1448_p12), [#allocation9], 4294966784  ;;  %v1090_v0 = vmov 0.0|0.0   ;;  %vm1091_vm0 = vmmov 0   ;;  %v1092_v1 = vmov 0.0   ;;  %v375_v2 = vld [vmem:[#allocation7] sm:$0xff] }
  0x9b   : > { %799 = vmatprep.subr.bf16.mxu0 %v1090_v0  ;;  %785 = vmatprep.mubr.msk.f32.mxu0 %vm1091_vm0, %v1092_v1  ;;  %v376_v3 = vld [vmem:[#allocation7 + $0x8] sm:$0xff]  ;;  %v377_v4 = vld [vmem:[#allocation7 + $0x10] sm:$0xff]  ;;  %v378_v6 = vld [vmem:[#allocation7 + $0x18] sm:$0xff]  ;;  %vm386_vm1 = vcmask 261120   ;;  %s367_s3 = scalar_lea.vmem [#allocation10], %s1337_s2  ;;  %s763_s23 = sshll.u32 %s1155_s28, 7 }
  0x9c   : > { %805 = vmatprep.subr.bf16.mxu1 %v1090_v0  ;;  %796 = vmatprep.mubr.msk.f32.mxu1 %vm1091_vm0, %v1092_v1  ;;  %v800_v5 = vpack.c.bf16 %v376_v3, %v375_v2  ;;  %v460_v7 = vld [vmem:[#allocation8] sm:$0xff]  ;;  %v461_v8 = vld [vmem:[#allocation8 + $0x8] sm:$0xff]  ;;  %v462_v9 = vld [vmem:[#allocation8 + $0x10] sm:$0xff]  ;;  %v803_v11 = vpack.c.bf16 %v378_v6, %v377_v4  ;;  %s604_s26 = sshll.u32 %s367_s3, 4  ;;  %s1374_s11 = scalar_lea.hbm %s1424_s7, %s763_s23  ;;  %s605_s26 = int_to_ptr.vmem [resolvable:$true] %s604_s26 }
  0x9d   : > { %v463_v10 = vld [vmem:[#allocation8 + $0x18] sm:$0xff]  ;;  %v806_v12 = vpack.c.bf16 %v461_v8, %v460_v7  ;;  %v373_v14 = vld [vmem:[%s310_s10] sm:$0xff]  ;;  %s588_s29 = scalar_lea.sflag [#allocation4], %s1334_s19  ;;  %s1004_s21 = scalar_lea.vmem %s605_s26, 128 }
  0x9e   : > { %801 = vmatpush3.bf16.msra.mxu0 %v800_v5  ;;  %v809_v13 = vpack.c.bf16 %v463_v10, %v462_v9  ;;  %v374_v15 = vld [vmem:[%s319_s15] sm:$0xff]  ;;  %v758_v16 = vld [vmem:[%s1421_s4] ss:$0 sm:$0xff]  ;;  %p1005_p2 = scmp.ne.s32.totalorder %s605_s26, %s1004_s21  ;;  %p1449_p13 = scmp.ne.s32.totalorder %s1440_s16, 0 }
  0x9f   : > { %802 = vmatprep.subr.bf16.mxu0 %v1090_v0  ;;  %807 = vmatpush3.bf16.msra.mxu1 %v806_v12  ;;  %v760_v20 = vld [vmem:[%s1422_s5] ss:$0 sm:$0xff]  ;;  %s1093_s10 = smov [#allocation10]  }
  0xa0   : > { %808 = vmatprep.subr.bf16.mxu1 %v1090_v0  ;;  %p1006_p6 = pnand %p1005_p2, %p1449_p13  ;;  %s1008_s9 = sshll.u32 %s1093_s10, 4  ;;  %s1009_s9 = int_to_ptr.vmem [resolvable:$false] %s1008_s9 }
  0xa1   : > { %s1010_s22 = scalar_lea.vmem %s1009_s9, 256  ;;  %p1011_p4 = scmp.lt.s32.totalorder %s605_s26, %s1009_s9 }
  0xa2   : > { %804 = vmatpush3.bf16.msra.mxu0 %v803_v11  ;;  %p1007_p10 = pneg %p1006_p6  ;;  %p1012_p5 = scmp.lt.s32.totalorder %s1010_s22, %s1004_s21 }
  0xa3   : > { %810 = vmatpush3.bf16.msra.mxu1 %v809_v13 }
  0xa4   : > { %p1013_p3 = por %p1012_p5, %p1011_p4 }
  0xa5   : > { %786 = vmatmul.mubr.msk.f32.vlgmr.msra.gmra.mrb[0].mxu0 %vm386_vm1, %v373_v14 }
  0xa6   : > { %797 = vmatmul.mubr.msk.f32.vlgmr.msra.gmra.mrb[0].mxu1 %vm386_vm1, %v374_v15  ;;  %p1014_p7 = pnand %p1013_p3, %p1007_p10 }
 0x178   : > { %v456_v17 = vpop.f32.mrb[0].mxu0 }
 0x179   : > { %v787_v18 = vpop.f32.mrb[1].mxu0  ;;  %v457_v19 = vadd.f32 %v758_v16, %v456_v17  ;;  %v540_v21 = vpop.f32.mrb[0].mxu1 }
 0x17a   : > { %v798_v22 = vpop.f32.mrb[1].mxu1  ;;  %v541_v23 = vadd.f32 %v760_v20, %v540_v21 }
 0x17b   : > { %544 = vxpose.xlu0.b32.start.end [1/1] (short) (narrow) %v457_v19, 32 }
 0x17c   : > { %581 = vst.msk [vmem:[%s367_s3] sm:$0xff] %vm386_vm1, %v541_v23 }
 0x17d   : > { %1017 = shalt.err (!%p1014_p7)
}
 0x17e   : > { %s1018_s19 = scalar_lea.hbm %s1374_s11, 128  ;;  %s1022_s30 = scalar_lea.hbm %s1424_s7, 256 }
 0x17f   : > { %p1019_p1 = scmp.ne.s32.totalorder %s1374_s11, %s1018_s19  ;;  %p1023_p0 = scmp.lt.u32.totalorder %s1374_s11, %s1424_s7 }
 0x180   : > { %p1024_p9 = scmp.lt.u32.totalorder %s1022_s30, %s1018_s19  ;;  %p1026_p2 = scmp.lt.u32.totalorder %s1018_s19, %s1374_s11 }
 0x181   : > { %p1020_p8 = pnand %p1019_p1, %p1449_p13 }
 0x182   : > { %p1025_p12 = por %p1024_p9, %p1023_p0 }
 0x183   : > { %p1021_p11 = pneg %p1020_p8 }
 0x184   : > { %p1027_p6 = por %p1026_p2, %p1025_p12 }
 0x186   : > { %p1028_p10 = pnand %p1027_p6, %p1021_p11 }
 0x188   : > { %1031 = shalt.err (!%p1028_p10)
}
 0x189   : > { %823 = dma.vmem_to_hbm [thread:$0]  (%p1449_p13), %s605_s26, 128, %s1374_s11, %s588_s29   ;;  %vm576_vm2 = vcmask 64512  }
 0x18a   : > { %p368_p4 = scmp.lt.s32.totalorder %s1155_s28, 1 }
 0x18c   : > { %s1459_s28 = smov (!%p368_p4, %s1155_s28), 1 }
 0x18d   : > { %s766_s18 = sshll.u32 %s1459_s28, 5 }
 0x18e   : > { %s372_s14 = scalar_lea.vmem %s1423_s6, %s766_s18 }
 0x1fb   : > { %v560_v24 = vpop.trf.xlu0 }
 0x1fc   : > { %577 = vst.msk [vmem:[%s372_s14] sm:$0xff] %vm576_vm2, %v560_v24 }
 0x1ff   : > { %v561_v25 = vpop.trf.xlu0 }
 0x200   : > { %578 = vst.msk [vmem:[%s372_s14 + $0x8] sm:$0xff] %vm576_vm2, %v561_v25 }
 0x203   : > { %v562_v26 = vpop.trf.xlu0 }
 0x204   : > { %579 = vst.msk [vmem:[%s372_s14 + $0x10] sm:$0xff] %vm576_vm2, %v562_v26 }
 0x207   : > { %v563_v27 = vpop.trf.xlu0 }
 0x208   : > { %580 = vst.msk [vmem:[%s372_s14 + $0x18] sm:$0xff] %vm576_vm2, %v563_v27 }
 0x209 PF: > { %s624_s16 = sand.u32 1, %s1070_s24   ;;  %p1450_p13 = scmp.ne.s32.totalorder %s1434_s8, 0 }
 0x20a   : > { %p1451_p5 = scmp.ge.s32.totalorder %s1082_s27, 2  ;;  %s625_s28 = scalar_lea.sflag [#allocation4], %s624_s16 }
 0x20c   : > { %p840_p3 = pnand %p1451_p5, %p1450_p13 }
 0x20e   : > { %1065 = dma.done.wait (!%p840_p3), %s625_s28, 128  }
 0x20f   : > { %1067 = vsyncadd (!%p840_p3), %s625_s28, 4294967168  ;;  %s1452_s26 = sld [smem:[#allocation16_spill]]  ;;  %s1453_s20 = sld [smem:[#allocation17_spill]] }
 0x210   : > { %p25_p7 = scmp.ge.s32.totalorder %s1244_s13, 4   ;;  %s1454_s24 = smov %s1074_s25 }
 0x211   : > { %s1457_s27 = smov %s1244_s13 }
 0x212   :  { %27 = sbr.rel (!%p25_p7) target bundleno = 11 (0xb), region = 122 }
 0x215   : > { %s1455_s25 = smov %s1452_s26  ;;  %s1456_s26 = smov %s1453_s20 }
 0x219   :  { %630 = vsyncpa [#allocation3], 1 }
 0x21a   :  { %632 = vsyncpa [#allocation3 + $0x1], 1 }
 0x21b   :  { %633 = vsyncpa [#allocation6], 1 }
 0x21c   :  { %635 = vsyncpa [#allocation6 + $0x1], 1 }
 0x21d   :  { %636 = vsyncpa [#allocation9], 1 }
 0x21e   :  { %637 = vsyncpa [#allocation4], 1 }
 0x21f   :  { %639 = vsyncpa [#allocation4 + $0x1], 1 }

</bundles_post_ra>
